<compile_context>
chip_gen: v5e
topology: v5e:2x2
jax: 0.10.0
libtpu: 0.0.40
codegen_flags: <defaults>
</compile_context>

<pallas_src>
import jax
import jax.numpy as jnp
from jax.experimental import pallas as pl
from jax.experimental.pallas import tpu as pltpu

_TARGET_TILE_BYTES = 4 << 20     # ~4 MiB per input tile (same for output)
_VMEM_LIMIT_BYTES = 48 << 20     # fits v7x's 64 MiB physical VMEM with headroom
_LANE_WIDTHS = (512, 256, 128)   # preferred lane-dense slab widths


def _frelu_kernel(x_ref, o_ref):
    # relu(x) + relu(-x) == |x|; single VALU op per vreg.
    o_ref[...] = jnp.abs(x_ref[...])


def frelu(x: jax.Array) -> jax.Array:
    """Applies FReLU (|x|) elementwise to an array of any shape via Pallas."""
    orig_shape = x.shape
    n = x.size
    if n == 0:
        return x

    dtype = x.dtype
    itemsize = jnp.dtype(dtype).itemsize
    # Sublane packing: 8 rows/vreg for 32-bit, 16 for 16-bit, 32 for 8-bit.
    sublane = 8 * max(1, 4 // itemsize)

    # Pick the widest lane-dense width that divides n; pad only if none does.
    width = None
    for w in _LANE_WIDTHS:
        if n % w == 0:
            width = w
            break

    x_flat = x.reshape(-1)
    if width is None:
        # Ragged tail (<512 elements): one unavoidable pad/slice pair.
        width = _LANE_WIDTHS[0]
        padded_n = pl.cdiv(n, width) * width
        x_flat = jnp.pad(x_flat, (0, padded_n - n))
    else:
        padded_n = n

    rows = padded_n // width
    x2d = x_flat.reshape(rows, width)

    # Max rows per tile for ~_TARGET_TILE_BYTES, rounded down to the sublane packing.
    max_tile_rows = max(
        sublane, (_TARGET_TILE_BYTES // (width * itemsize)) // sublane * sublane
    )

    if rows <= max_tile_rows:
        if rows >= 2 * sublane:
            # Force >=2 grid steps so both v7x TensorCores engage and the
            # input/output DMAs of adjacent steps overlap.
            tile_rows = pl.cdiv(pl.cdiv(rows, 2), sublane) * sublane
        else:
            # Full extent: legal even when not a multiple of the sublane packing.
            tile_rows = rows
    else:
        tile_rows = max_tile_rows

    grid_rows = pl.cdiv(rows, tile_rows)  # ragged last block is masked by Pallas

    out2d = pl.pallas_call(
        _frelu_kernel,
        out_shape=jax.ShapeDtypeStruct((rows, width), dtype),
        grid_spec=pltpu.PrefetchScalarGridSpec(
            num_scalar_prefetch=0,
            grid=(grid_rows,),
            in_specs=[pl.BlockSpec((tile_rows, width), lambda i: (i, 0))],
            out_specs=pl.BlockSpec((tile_rows, width), lambda i: (i, 0)),
        ),
        compiler_params=pltpu.CompilerParams(
            dimension_semantics=("parallel",),
            vmem_limit_bytes=_VMEM_LIMIT_BYTES,
        ),
    )(x2d)

    out_flat = out2d.reshape(-1)
    if padded_n != n:
        out_flat = out_flat[:n]
    return out_flat.reshape(orig_shape)


if __name__ == "__main__":
    key = jax.random.PRNGKey(0)

    # Small NCHW input consistent with how FReLU is used inside conv nets.
    x = jax.random.normal(key, (2, 4, 16, 16), dtype=jnp.float32)
    out = jax.block_until_ready(frelu(x))
    ref = jnp.maximum(x, 0.0) + jnp.maximum(-x, 0.0)
    assert out.shape == x.shape and out.dtype == x.dtype
    assert jnp.allclose(out, ref), "mismatch vs reference (small)"

    # Slightly larger input to exercise the multi-step (>=2 grid blocks) path.
    x2 = jax.random.normal(jax.random.PRNGKey(1), (4, 8, 32, 32), dtype=jnp.float32)
    out2 = jax.block_until_ready(frelu(x2))
    ref2 = jnp.maximum(x2, 0.0) + jnp.maximum(-x2, 0.0)
    assert out2.shape == x2.shape and out2.dtype == x2.dtype
    assert jnp.allclose(out2, ref2), "mismatch vs reference (multi-block)"

    print("KERNEL_OK")
</pallas_src>

<mosaic_0001>
module attributes {stable_mosaic.version = 11 : i64} {
  func.func @_frelu_kernel(%arg0: i32, %arg1: memref<4x512xf32, #tpu.memory_space<vmem>>, %arg2: memref<4x512xf32, #tpu.memory_space<vmem>>) attributes {dimension_semantics = [#tpu.dimension_semantics<parallel>], iteration_bounds = array<i64: 1>, scalar_prefetch = 0 : i64, scratch_operands = 0 : i64, tpu.core_type = #tpu.core_type<tc>, window_params = [{transform_indices = @transform_0, window_bounds = array<i64: 4, 512>}, {transform_indices = @transform_1, window_bounds = array<i64: 4, 512>}]} {
    %c0 = arith.constant 0 : index
    %c0_0 = arith.constant 0 : index
    %0 = vector.load %arg1[%c0, %c0_0] : memref<4x512xf32, #tpu.memory_space<vmem>>, vector<4x512xf32>
    %1 = math.absf %0 : vector<4x512xf32>
    %c0_1 = arith.constant 0 : index
    %c0_2 = arith.constant 0 : index
    %2 = vector.load %arg2[%c0_1, %c0_2] : memref<4x512xf32, #tpu.memory_space<vmem>>, vector<4x512xf32>
    tpu.vector_store %arg2[%c0_1, %c0_2], %1 {strides = array<i32>} : memref<4x512xf32, #tpu.memory_space<vmem>>, vector<4x512xf32>,
    return
  }
  func.func @transform_0(%arg0: i32) -> (i32, i32) {
    %c0_i32 = arith.constant 0 : i32
    %c0_i32_0 = arith.constant 0 : i32
    return %arg0, %c0_i32 : i32, i32
  }
  func.func @transform_1(%arg0: i32) -> (i32, i32) {
    %c0_i32 = arith.constant 0 : i32
    %c0_i32_0 = arith.constant 0 : i32
    return %arg0, %c0_i32 : i32, i32
  }
}

</mosaic_0001>

<bundles_post_ra>
// kernel: tpu_custom_call.1
= control target key start
LH: loop header
LB: loop body
LE: loop exit
PB: predicated region body
PF: predicated region fallthrough
CT: control target
= control target key end

     0   :  { %6 = vsyncpa [#allocation3], 0  ;;  %s118_s0 = inlined_call_operand.hbm [shape: f32[4,512], index: 0, kind: input, shape index: {}]   ;;  %s119_s1 = inlined_call_operand.hbm [shape: f32[4,512], index: 1, kind: output, shape index: {}]  }
   0x1   :  { %7 = vsyncpa [#allocation4], 0  ;;  %s13_s8 = sshll.u32 %s118_s0, 4  ;;  %s100_s9 = smov [#allocation2]   ;;  %s14_s8 = int_to_ptr.hbm [resolvable:$true] %s13_s8 }
   0x2   :  { %s15_s10 = sshll.u32 %s100_s9, 4  ;;  %s16_s10 = int_to_ptr.vmem [resolvable:$true] %s15_s10 }
   0x3   :  { %18 = dma.hbm_to_vmem [thread:$0]  %s14_s8, 256, %s16_s10, [#allocation3]  }
   0x4   :  { %96 = dma.done.wait [#allocation3], 256  }
   0x5   :  { %97 = vsyncadd [#allocation3], 4294967040  ;;  %s101_s11 = smov [#allocation5]   ;;  %s36_s15 = sshll.u32 %s119_s1, 4  ;;  %v23_v0 = vld [vmem:[#allocation2] sm:$0xff]  ;;  %v24_v1 = vld [vmem:[#allocation2 + $0x8] sm:$0xff]  ;;  %s37_s15 = int_to_ptr.hbm [resolvable:$true] %s36_s15 }
   0x6   :  { %s34_s12 = sshll.u32 %s101_s11, 4  ;;  %v25_v2 = vand.u32 2147483647, %v23_v0  ;;  %v26_v3 = vand.u32 2147483647, %v24_v1  ;;  %s35_s12 = int_to_ptr.vmem [resolvable:$true] %s34_s12 }
   0x8   :  { %27 = vst [vmem:[#allocation5] sm:$0xff] %v25_v2 }
   0x9   :  { %28 = vst [vmem:[#allocation5 + $0x8] sm:$0xff] %v26_v3 }
   0xa   :  { %39 = dma.vmem_to_hbm [thread:$0]  %s35_s12, 256, %s37_s15, [#allocation4]  }
   0xb   :  { %98 = dma.done.wait [#allocation4], 256  }
   0xc   :  { %99 = vsyncadd [#allocation4], 4294967040 }
   0xd   :  { %44 = vsyncpa [#allocation3], 1 }
   0xe   :  { %45 = vsyncpa [#allocation4], 1 }

</bundles_post_ra>
